<compile_context>
chip_gen: v7x
topology: tpu7x:2x2x1
jax: 0.10.0
libtpu: 0.0.40
codegen_flags: <defaults>
</compile_context>

<pallas_src>
import functools

import jax
import jax.numpy as jnp
from jax import lax
from jax.experimental import pallas as pl
from jax.experimental.pallas import tpu as pltpu


def _residual_block_kernel(x_ref, w1_ref, b1_ref, w2_ref, b2_ref, mask_ref, o_ref,
                           *, W, matmul_dtype):
    """relu(conv2(relu(conv1(x))) + x) on a (Cp, St) lane-flattened block.

    x_ref    : (Cp, St)       input, St = (#images in this block) * H * W
    w1_ref   : (3, Cp, 3*Cp)  conv1 weight, [kh][c_out, kw*Cp + c_in]
    b1_ref   : (Cp, 1)        conv1 bias
    w2_ref   : (3, Cp, 3*Cp)  conv2 weight
    b2_ref   : (Cp, 1)        conv2 bias
    mask_ref : (9, St)        precomputed 0/1 border masks, row = kh*3 + kw
    o_ref    : (Cp, St)       output
    """
    Cp, St = x_ref.shape
    x = x_ref[...]                                       # (Cp, St) f32

    def conv3x3(inp_f32, w_ref):
        inp = inp_f32.astype(matmul_dtype)
        acc = None
        # Three accumulating MXU dots over the kh row-groups: peak live im2col
        # is (3*Cp, St) instead of (9*Cp, St).
        for kh in range(3):
            pieces = []
            for kw in range(3):
                tap = kh * 3 + kw
                d = (kh - 1) * W + (kw - 1)              # flattened spatial offset
                if d == 0:
                    pieces.append(inp)
                else:
                    # y[s] = x[s + d], circular roll (XLU slot); the resident
                    # host-built mask zeroes every position where the roll
                    # crossed an image border (incl. image-to-image and
                    # block-end wraps).
                    shifted = pltpu.roll(inp, shift=(-d) % St, axis=1)
                    pieces.append(shifted * mask_ref[tap:tap + 1, :])
            patches = jnp.concatenate(pieces, axis=0)    # (3*Cp, St), tile-aligned
            part = lax.dot_general(
                w_ref[kh].astype(matmul_dtype), patches,
                dimension_numbers=(((1,), (0,)), ((), ())),
                preferred_element_type=jnp.float32)      # (Cp, St) f32
            acc = part if acc is None else acc + part
        return acc

    h1 = jnp.maximum(conv3x3(x, w1_ref) + b1_ref[...], 0.0)
    out = conv3x3(h1, w2_ref) + b2_ref[...] + x          # residual add
    o_ref[...] = jnp.maximum(out, 0.0)


def _border_masks(num_images, H, W, dtype):
    """(9, num_images*H*W) 0/1 masks; mask[kh*3+kw, s] == 1 iff tap (kh-1, kw-1)
    taken at flattened position s stays inside its own image."""
    S = H * W
    s = jnp.arange(num_images * S)
    h = (s % S) // W
    w = s % W
    rows = []
    for kh in range(3):
        for kw in range(3):
            dh, dw = kh - 1, kw - 1
            rows.append((h + dh >= 0) & (h + dh < H) & (w + dw >= 0) & (w + dw < W))
    return jnp.stack(rows, axis=0).astype(dtype)


def _default_grid_steps(num_images):
    # v7x has 2 TensorCores per chip (sharded via "parallel" grid axes) -> keep
    # at least 2 grid steps there.  v5e/v6e have 1 TC, where a single big block
    # amortizes the fixed per-step pipeline overhead best.
    try:
        kind = jax.devices()[0].device_kind.lower()
    except Exception:  # pragma: no cover - defensive, keep the kernel runnable
        kind = ""
    num_tc = 2 if "v7" in kind else 1
    if num_tc > 1 and num_images % num_tc == 0:
        return num_tc
    return 1


@functools.partial(jax.jit, static_argnames=("matmul_dtype", "grid_steps"))
def residual_block_nchw(x, w1, b1, w2, b2, *, matmul_dtype=jnp.float32,
                        grid_steps=None):
    """Fused ResidualBlock forward (stride=1).

    x: (N, C, H, W) f32.  w1/w2: (C, C, 3, 3) OIHW (PyTorch).  b1/b2: (C,).
    """
    N, C, H, W = x.shape
    S = H * W
    Cp = -(-C // 8) * 8                      # pad channels to f32 sublane multiple

    steps = _default_grid_steps(N) if grid_steps is None else grid_steps
    if steps > 1 and (N % steps != 0 or (N // steps) * S % 128 != 0):
        steps = 1                            # fall back to one full-batch block
    St_blk = (N // steps) * S

    # Lane-dense layout: fold the batch into the lane axis -> (Cp, N*H*W).
    x_cs = jnp.transpose(x, (1, 0, 2, 3)).reshape(C, N * S)
    x_cs = jnp.pad(x_cs, ((0, Cp - C), (0, 0)))

    def prep_w(w):
        # (c_out, c_in, kh, kw) -> (kh, c_out, kw, c_in), zero-pad both channel
        # axes, flatten so row kw*Cp + c_in matches the patch-row ordering.
        w_t = jnp.transpose(w, (2, 0, 3, 1))
        w_t = jnp.pad(w_t, ((0, 0), (0, Cp - C), (0, 0), (0, Cp - C)))
        return w_t.reshape(3, Cp, 3 * Cp)

    w1_f, w2_f = prep_w(w1), prep_w(w2)
    b1_p = jnp.pad(b1, (0, Cp - C)).reshape(Cp, 1)
    b2_p = jnp.pad(b2, (0, Cp - C)).reshape(Cp, 1)
    masks = _border_masks(N, H, W, matmul_dtype)         # (9, N*S), resident

    # TODO(synk): for large images, tile S into >=512-lane H-row strips with a
    #             1-row halo (Buffered(2)) and set vmem_limit_bytes from the
    #             64 MiB v7x budget instead of relying on v6e defaults.
    out = pl.pallas_call(
        functools.partial(_residual_block_kernel, W=W, matmul_dtype=matmul_dtype),
        grid=(steps,),
        in_specs=[
            pl.BlockSpec((Cp, St_blk), lambda g: (0, g)),
            pl.BlockSpec((3, Cp, 3 * Cp), lambda g: (0, 0, 0)),
            pl.BlockSpec((Cp, 1), lambda g: (0, 0)),
            pl.BlockSpec((3, Cp, 3 * Cp), lambda g: (0, 0, 0)),
            pl.BlockSpec((Cp, 1), lambda g: (0, 0)),
            pl.BlockSpec((9, St_blk), lambda g: (0, g)),
        ],
        out_specs=pl.BlockSpec((Cp, St_blk), lambda g: (0, g)),
        out_shape=jax.ShapeDtypeStruct((Cp, N * S), jnp.float32),
        compiler_params=pltpu.CompilerParams(
            dimension_semantics=("parallel",)),
    )(x_cs, w1_f, b1_p, w2_f, b2_p, masks)

    return out[:C].reshape(C, N, H, W).transpose(1, 0, 2, 3)


def _reference_nchw(x, w1, b1, w2, b2):
    """Pure-JAX reference (NCHW / OIHW), matching the PyTorch module (stride=1)."""
    dn = ("NCHW", "OIHW", "NCHW")
    h = lax.conv_general_dilated(x, w1, (1, 1), "SAME", dimension_numbers=dn)
    h = jnp.maximum(h + b1[None, :, None, None], 0.0)
    o = lax.conv_general_dilated(h, w2, (1, 1), "SAME", dimension_numbers=dn)
    return jnp.maximum(o + b2[None, :, None, None] + x, 0.0)


if __name__ == "__main__":
    key = jax.random.PRNGKey(0)
    k_x, k_w1, k_b1, k_w2, k_b2 = jax.random.split(key, 5)

    N, C, H, W = 2, 4, 16, 16   # small NCHW input, matching ResidualBlock(channels=4)

    x = jax.random.normal(k_x, (N, C, H, W), dtype=jnp.float32)
    # PyTorch-native OIHW weights, (C,) biases.
    w1 = jax.random.normal(k_w1, (C, C, 3, 3), dtype=jnp.float32) * 0.1
    b1 = jax.random.normal(k_b1, (C,), dtype=jnp.float32) * 0.1
    w2 = jax.random.normal(k_w2, (C, C, 3, 3), dtype=jnp.float32) * 0.1
    b2 = jax.random.normal(k_b2, (C,), dtype=jnp.float32) * 0.1

    out = jax.block_until_ready(residual_block_nchw(x, w1, b1, w2, b2))

    ref = _reference_nchw(x, w1, b1, w2, b2)
    assert out.shape == (N, C, H, W)
    assert jnp.allclose(out, ref, atol=1e-3, rtol=1e-3), "mismatch vs reference conv"

    print("KERNEL_OK")
</pallas_src>

<mosaic_0001>
module attributes {stable_mosaic.version = 11 : i64} {
  func.func @_residual_block_kernel(%arg0: i32, %arg1: memref<8x512xf32, #tpu.memory_space<vmem>>, %arg2: memref<3x8x24xf32, #tpu.memory_space<vmem>>, %arg3: memref<8x1xf32, #tpu.memory_space<vmem>>, %arg4: memref<3x8x24xf32, #tpu.memory_space<vmem>>, %arg5: memref<8x1xf32, #tpu.memory_space<vmem>>, %arg6: memref<9x512xf32, #tpu.memory_space<vmem>>, %arg7: memref<8x512xf32, #tpu.memory_space<vmem>>) attributes {dimension_semantics = [#tpu.dimension_semantics<parallel>], iteration_bounds = array<i64: 1>, scalar_prefetch = 0 : i64, scratch_operands = 0 : i64, tpu.core_type = #tpu.core_type<tc>, window_params = [{transform_indices = @transform_0, window_bounds = array<i64: 8, 512>}, {pipeline_mode = #tpu.pipeline_mode<synchronous>, transform_indices = @transform_1, window_bounds = array<i64: 3, 8, 24>}, {pipeline_mode = #tpu.pipeline_mode<synchronous>, transform_indices = @transform_2, window_bounds = array<i64: 8, 1>}, {pipeline_mode = #tpu.pipeline_mode<synchronous>, transform_indices = @transform_3, window_bounds = array<i64: 3, 8, 24>}, {pipeline_mode = #tpu.pipeline_mode<synchronous>, transform_indices = @transform_4, window_bounds = array<i64: 8, 1>}, {transform_indices = @transform_5, window_bounds = array<i64: 9, 512>}, {transform_indices = @transform_6, window_bounds = array<i64: 8, 512>}]} {
    %c0 = arith.constant 0 : index
    %c0_0 = arith.constant 0 : index
    %0 = vector.load %arg1[%c0, %c0_0] : memref<8x512xf32, #tpu.memory_space<vmem>>, vector<8x512xf32>
    %c17_i32 = arith.constant 17 : i32
    %1 = tpu.dynamic_rotate %0 by %c17_i32 dim 1 : vector<8x512xf32>, i32 -> vector<8x512xf32>
    %c0_1 = arith.constant 0 : index
    %c0_2 = arith.constant 0 : index
    %2 = vector.load %arg6[%c0_1, %c0_2] : memref<9x512xf32, #tpu.memory_space<vmem>>, vector<1x512xf32>
    %3 = vector.broadcast %2 : vector<1x512xf32> to vector<8x512xf32>
    %4 = arith.mulf %1, %3 : vector<8x512xf32>
    %c16_i32 = arith.constant 16 : i32
    %5 = tpu.dynamic_rotate %0 by %c16_i32 dim 1 : vector<8x512xf32>, i32 -> vector<8x512xf32>
    %c1 = arith.constant 1 : index
    %c0_3 = arith.constant 0 : index
    %6 = vector.load %arg6[%c1, %c0_3] : memref<9x512xf32, #tpu.memory_space<vmem>>, vector<1x512xf32>
    %7 = vector.broadcast %6 : vector<1x512xf32> to vector<8x512xf32>
    %8 = arith.mulf %5, %7 : vector<8x512xf32>
    %c15_i32 = arith.constant 15 : i32
    %9 = tpu.dynamic_rotate %0 by %c15_i32 dim 1 : vector<8x512xf32>, i32 -> vector<8x512xf32>
    %c2 = arith.constant 2 : index
    %c0_4 = arith.constant 0 : index
    %10 = vector.load %arg6[%c2, %c0_4] : memref<9x512xf32, #tpu.memory_space<vmem>>, vector<1x512xf32>
    %11 = vector.broadcast %10 : vector<1x512xf32> to vector<8x512xf32>
    %12 = arith.mulf %9, %11 : vector<8x512xf32>
    %13 = tpu.concatenate %4, %8, %12 in 0 : vector<8x512xf32>, vector<8x512xf32>, vector<8x512xf32> -> vector<24x512xf32>
    %c0_5 = arith.constant 0 : index
    %c0_6 = arith.constant 0 : index
    %c0_7 = arith.constant 0 : index
    %14 = vector.load %arg2[%c0_5, %c0_6, %c0_7] : memref<3x8x24xf32, #tpu.memory_space<vmem>>, vector<1x8x24xf32>
    %15 = vector.shape_cast %14 : vector<1x8x24xf32> to vector<8x24xf32>
    %cst = arith.constant dense<0.000000e+00> : vector<8x512xf32>
    %16 = tpu.matmul %15, %13, %cst {dimension_numbers = #tpu.dot_dimension_numbers<[1], [0], [0], [1], [0, 0, 1, 1], [], []>} : vector<8x24xf32>, vector<24x512xf32>, vector<8x512xf32> -> vector<8x512xf32>
    %c1_i32 = arith.constant 1 : i32
    %17 = tpu.dynamic_rotate %0 by %c1_i32 dim 1 : vector<8x512xf32>, i32 -> vector<8x512xf32>
    %c3 = arith.constant 3 : index
    %c0_8 = arith.constant 0 : index
    %18 = vector.load %arg6[%c3, %c0_8] : memref<9x512xf32, #tpu.memory_space<vmem>>, vector<1x512xf32>
    %19 = vector.broadcast %18 : vector<1x512xf32> to vector<8x512xf32>
    %20 = arith.mulf %17, %19 : vector<8x512xf32>
    %c511_i32 = arith.constant 511 : i32
    %21 = tpu.dynamic_rotate %0 by %c511_i32 dim 1 : vector<8x512xf32>, i32 -> vector<8x512xf32>
    %c5 = arith.constant 5 : index
    %c0_9 = arith.constant 0 : index
    %22 = vector.load %arg6[%c5, %c0_9] : memref<9x512xf32, #tpu.memory_space<vmem>>, vector<1x512xf32>
    %23 = vector.broadcast %22 : vector<1x512xf32> to vector<8x512xf32>
    %24 = arith.mulf %21, %23 : vector<8x512xf32>
    %25 = tpu.concatenate %20, %0, %24 in 0 : vector<8x512xf32>, vector<8x512xf32>, vector<8x512xf32> -> vector<24x512xf32>
    %c1_10 = arith.constant 1 : index
    %c0_11 = arith.constant 0 : index
    %c0_12 = arith.constant 0 : index
    %26 = vector.load %arg2[%c1_10, %c0_11, %c0_12] : memref<3x8x24xf32, #tpu.memory_space<vmem>>, vector<1x8x24xf32>
    %27 = vector.shape_cast %26 : vector<1x8x24xf32> to vector<8x24xf32>
    %cst_13 = arith.constant dense<0.000000e+00> : vector<8x512xf32>
    %28 = tpu.matmul %27, %25, %cst_13 {dimension_numbers = #tpu.dot_dimension_numbers<[1], [0], [0], [1], [0, 0, 1, 1], [], []>} : vector<8x24xf32>, vector<24x512xf32>, vector<8x512xf32> -> vector<8x512xf32>
    %29 = arith.addf %16, %28 : vector<8x512xf32>
    %c497_i32 = arith.constant 497 : i32
    %30 = tpu.dynamic_rotate %0 by %c497_i32 dim 1 : vector<8x512xf32>, i32 -> vector<8x512xf32>
    %c6 = arith.constant 6 : index
    %c0_14 = arith.constant 0 : index
    %31 = vector.load %arg6[%c6, %c0_14] : memref<9x512xf32, #tpu.memory_space<vmem>>, vector<1x512xf32>
    %32 = vector.broadcast %31 : vector<1x512xf32> to vector<8x512xf32>
    %33 = arith.mulf %30, %32 : vector<8x512xf32>
    %c496_i32 = arith.constant 496 : i32
    %34 = tpu.dynamic_rotate %0 by %c496_i32 dim 1 : vector<8x512xf32>, i32 -> vector<8x512xf32>
    %c7 = arith.constant 7 : index
    %c0_15 = arith.constant 0 : index
    %35 = vector.load %arg6[%c7, %c0_15] : memref<9x512xf32, #tpu.memory_space<vmem>>, vector<1x512xf32>
    %36 = vector.broadcast %35 : vector<1x512xf32> to vector<8x512xf32>
    %37 = arith.mulf %34, %36 : vector<8x512xf32>
    %c495_i32 = arith.constant 495 : i32
    %38 = tpu.dynamic_rotate %0 by %c495_i32 dim 1 : vector<8x512xf32>, i32 -> vector<8x512xf32>
    %c8 = arith.constant 8 : index
    %c0_16 = arith.constant 0 : index
    %39 = vector.load %arg6[%c8, %c0_16] : memref<9x512xf32, #tpu.memory_space<vmem>>, vector<1x512xf32>
    %40 = vector.broadcast %39 : vector<1x512xf32> to vector<8x512xf32>
    %41 = arith.mulf %38, %40 : vector<8x512xf32>
    %42 = tpu.concatenate %33, %37, %41 in 0 : vector<8x512xf32>, vector<8x512xf32>, vector<8x512xf32> -> vector<24x512xf32>
    %c2_17 = arith.constant 2 : index
    %c0_18 = arith.constant 0 : index
    %c0_19 = arith.constant 0 : index
    %43 = vector.load %arg2[%c2_17, %c0_18, %c0_19] : memref<3x8x24xf32, #tpu.memory_space<vmem>>, vector<1x8x24xf32>
    %44 = vector.shape_cast %43 : vector<1x8x24xf32> to vector<8x24xf32>
    %cst_20 = arith.constant dense<0.000000e+00> : vector<8x512xf32>
    %45 = tpu.matmul %44, %42, %cst_20 {dimension_numbers = #tpu.dot_dimension_numbers<[1], [0], [0], [1], [0, 0, 1, 1], [], []>} : vector<8x24xf32>, vector<24x512xf32>, vector<8x512xf32> -> vector<8x512xf32>
    %46 = arith.addf %29, %45 : vector<8x512xf32>
    %c0_21 = arith.constant 0 : index
    %c0_22 = arith.constant 0 : index
    %47 = vector.load %arg3[%c0_21, %c0_22] : memref<8x1xf32, #tpu.memory_space<vmem>>, vector<8x1xf32>
    %48 = vector.broadcast %47 : vector<8x1xf32> to vector<8x512xf32>
    %49 = arith.addf %46, %48 : vector<8x512xf32>
    %cst_23 = arith.constant 0.000000e+00 : f32
    %50 = vector.broadcast %cst_23 : f32 to vector<8x512xf32>
    %51 = arith.maximumf %49, %50 : vector<8x512xf32>
    %c17_i32_24 = arith.constant 17 : i32
    %52 = tpu.dynamic_rotate %51 by %c17_i32_24 dim 1 : vector<8x512xf32>, i32 -> vector<8x512xf32>
    %c0_25 = arith.constant 0 : index
    %c0_26 = arith.constant 0 : index
    %53 = vector.load %arg6[%c0_25, %c0_26] : memref<9x512xf32, #tpu.memory_space<vmem>>, vector<1x512xf32>
    %54 = vector.broadcast %53 : vector<1x512xf32> to vector<8x512xf32>
    %55 = arith.mulf %52, %54 : vector<8x512xf32>
    %c16_i32_27 = arith.constant 16 : i32
    %56 = tpu.dynamic_rotate %51 by %c16_i32_27 dim 1 : vector<8x512xf32>, i32 -> vector<8x512xf32>
    %c1_28 = arith.constant 1 : index
    %c0_29 = arith.constant 0 : index
    %57 = vector.load %arg6[%c1_28, %c0_29] : memref<9x512xf32, #tpu.memory_space<vmem>>, vector<1x512xf32>
    %58 = vector.broadcast %57 : vector<1x512xf32> to vector<8x512xf32>
    %59 = arith.mulf %56, %58 : vector<8x512xf32>
    %c15_i32_30 = arith.constant 15 : i32
    %60 = tpu.dynamic_rotate %51 by %c15_i32_30 dim 1 : vector<8x512xf32>, i32 -> vector<8x512xf32>
    %c2_31 = arith.constant 2 : index
    %c0_32 = arith.constant 0 : index
    %61 = vector.load %arg6[%c2_31, %c0_32] : memref<9x512xf32, #tpu.memory_space<vmem>>, vector<1x512xf32>
    %62 = vector.broadcast %61 : vector<1x512xf32> to vector<8x512xf32>
    %63 = arith.mulf %60, %62 : vector<8x512xf32>
    %64 = tpu.concatenate %55, %59, %63 in 0 : vector<8x512xf32>, vector<8x512xf32>, vector<8x512xf32> -> vector<24x512xf32>
    %c0_33 = arith.constant 0 : index
    %c0_34 = arith.constant 0 : index
    %c0_35 = arith.constant 0 : index
    %65 = vector.load %arg4[%c0_33, %c0_34, %c0_35] : memref<3x8x24xf32, #tpu.memory_space<vmem>>, vector<1x8x24xf32>
    %66 = vector.shape_cast %65 : vector<1x8x24xf32> to vector<8x24xf32>
    %cst_36 = arith.constant dense<0.000000e+00> : vector<8x512xf32>
    %67 = tpu.matmul %66, %64, %cst_36 {dimension_numbers = #tpu.dot_dimension_numbers<[1], [0], [0], [1], [0, 0, 1, 1], [], []>} : vector<8x24xf32>, vector<24x512xf32>, vector<8x512xf32> -> vector<8x512xf32>
    %c1_i32_37 = arith.constant 1 : i32
    %68 = tpu.dynamic_rotate %51 by %c1_i32_37 dim 1 : vector<8x512xf32>, i32 -> vector<8x512xf32>
    %c3_38 = arith.constant 3 : index
    %c0_39 = arith.constant 0 : index
    %69 = vector.load %arg6[%c3_38, %c0_39] : memref<9x512xf32, #tpu.memory_space<vmem>>, vector<1x512xf32>
    %70 = vector.broadcast %69 : vector<1x512xf32> to vector<8x512xf32>
    %71 = arith.mulf %68, %70 : vector<8x512xf32>
    %c511_i32_40 = arith.constant 511 : i32
    %72 = tpu.dynamic_rotate %51 by %c511_i32_40 dim 1 : vector<8x512xf32>, i32 -> vector<8x512xf32>
    %c5_41 = arith.constant 5 : index
    %c0_42 = arith.constant 0 : index
    %73 = vector.load %arg6[%c5_41, %c0_42] : memref<9x512xf32, #tpu.memory_space<vmem>>, vector<1x512xf32>
    %74 = vector.broadcast %73 : vector<1x512xf32> to vector<8x512xf32>
    %75 = arith.mulf %72, %74 : vector<8x512xf32>
    %76 = tpu.concatenate %71, %51, %75 in 0 : vector<8x512xf32>, vector<8x512xf32>, vector<8x512xf32> -> vector<24x512xf32>
    %c1_43 = arith.constant 1 : index
    %c0_44 = arith.constant 0 : index
    %c0_45 = arith.constant 0 : index
    %77 = vector.load %arg4[%c1_43, %c0_44, %c0_45] : memref<3x8x24xf32, #tpu.memory_space<vmem>>, vector<1x8x24xf32>
    %78 = vector.shape_cast %77 : vector<1x8x24xf32> to vector<8x24xf32>
    %cst_46 = arith.constant dense<0.000000e+00> : vector<8x512xf32>
    %79 = tpu.matmul %78, %76, %cst_46 {dimension_numbers = #tpu.dot_dimension_numbers<[1], [0], [0], [1], [0, 0, 1, 1], [], []>} : vector<8x24xf32>, vector<24x512xf32>, vector<8x512xf32> -> vector<8x512xf32>
    %80 = arith.addf %67, %79 : vector<8x512xf32>
    %c497_i32_47 = arith.constant 497 : i32
    %81 = tpu.dynamic_rotate %51 by %c497_i32_47 dim 1 : vector<8x512xf32>, i32 -> vector<8x512xf32>
    %c6_48 = arith.constant 6 : index
    %c0_49 = arith.constant 0 : index
    %82 = vector.load %arg6[%c6_48, %c0_49] : memref<9x512xf32, #tpu.memory_space<vmem>>, vector<1x512xf32>
    %83 = vector.broadcast %82 : vector<1x512xf32> to vector<8x512xf32>
    %84 = arith.mulf %81, %83 : vector<8x512xf32>
    %c496_i32_50 = arith.constant 496 : i32
    %85 = tpu.dynamic_rotate %51 by %c496_i32_50 dim 1 : vector<8x512xf32>, i32 -> vector<8x512xf32>
    %c7_51 = arith.constant 7 : index
    %c0_52 = arith.constant 0 : index
    %86 = vector.load %arg6[%c7_51, %c0_52] : memref<9x512xf32, #tpu.memory_space<vmem>>, vector<1x512xf32>
    %87 = vector.broadcast %86 : vector<1x512xf32> to vector<8x512xf32>
    %88 = arith.mulf %85, %87 : vector<8x512xf32>
    %c495_i32_53 = arith.constant 495 : i32
    %89 = tpu.dynamic_rotate %51 by %c495_i32_53 dim 1 : vector<8x512xf32>, i32 -> vector<8x512xf32>
    %c8_54 = arith.constant 8 : index
    %c0_55 = arith.constant 0 : index
    %90 = vector.load %arg6[%c8_54, %c0_55] : memref<9x512xf32, #tpu.memory_space<vmem>>, vector<1x512xf32>
    %91 = vector.broadcast %90 : vector<1x512xf32> to vector<8x512xf32>
    %92 = arith.mulf %89, %91 : vector<8x512xf32>
    %93 = tpu.concatenate %84, %88, %92 in 0 : vector<8x512xf32>, vector<8x512xf32>, vector<8x512xf32> -> vector<24x512xf32>
    %c2_56 = arith.constant 2 : index
    %c0_57 = arith.constant 0 : index
    %c0_58 = arith.constant 0 : index
    %94 = vector.load %arg4[%c2_56, %c0_57, %c0_58] : memref<3x8x24xf32, #tpu.memory_space<vmem>>, vector<1x8x24xf32>
    %95 = vector.shape_cast %94 : vector<1x8x24xf32> to vector<8x24xf32>
    %cst_59 = arith.constant dense<0.000000e+00> : vector<8x512xf32>
    %96 = tpu.matmul %95, %93, %cst_59 {dimension_numbers = #tpu.dot_dimension_numbers<[1], [0], [0], [1], [0, 0, 1, 1], [], []>} : vector<8x24xf32>, vector<24x512xf32>, vector<8x512xf32> -> vector<8x512xf32>
    %97 = arith.addf %80, %96 : vector<8x512xf32>
    %c0_60 = arith.constant 0 : index
    %c0_61 = arith.constant 0 : index
    %98 = vector.load %arg5[%c0_60, %c0_61] : memref<8x1xf32, #tpu.memory_space<vmem>>, vector<8x1xf32>
    %99 = vector.broadcast %98 : vector<8x1xf32> to vector<8x512xf32>
    %100 = arith.addf %97, %99 : vector<8x512xf32>
    %101 = arith.addf %100, %0 : vector<8x512xf32>
    %cst_62 = arith.constant 0.000000e+00 : f32
    %102 = vector.broadcast %cst_62 : f32 to vector<8x512xf32>
    %103 = arith.maximumf %101, %102 : vector<8x512xf32>
    %c0_63 = arith.constant 0 : index
    %c0_64 = arith.constant 0 : index
    %104 = vector.load %arg7[%c0_63, %c0_64] : memref<8x512xf32, #tpu.memory_space<vmem>>, vector<8x512xf32>
    tpu.vector_store %arg7[%c0_63, %c0_64], %103 {strides = array<i32>} : memref<8x512xf32, #tpu.memory_space<vmem>>, vector<8x512xf32>,
    return
  }
  func.func @transform_0(%arg0: i32) -> (i32, i32) {
    %c0_i32 = arith.constant 0 : i32
    %c0_i32_0 = arith.constant 0 : i32
    return %c0_i32, %arg0 : i32, i32
  }
  func.func @transform_1(%arg0: i32) -> (i32, i32, i32) {
    %c0_i32 = arith.constant 0 : i32
    %c0_i32_0 = arith.constant 0 : i32
    %c0_i32_1 = arith.constant 0 : i32
    %c0_i32_2 = arith.constant 0 : i32
    return %c0_i32, %c0_i32_0, %c0_i32_1 : i32, i32, i32
  }
  func.func @transform_2(%arg0: i32) -> (i32, i32) {
    %c0_i32 = arith.constant 0 : i32
    %c0_i32_0 = arith.constant 0 : i32
    %c0_i32_1 = arith.constant 0 : i32
    return %c0_i32, %c0_i32_0 : i32, i32
  }
  func.func @transform_3(%arg0: i32) -> (i32, i32, i32) {
    %c0_i32 = arith.constant 0 : i32
    %c0_i32_0 = arith.constant 0 : i32
    %c0_i32_1 = arith.constant 0 : i32
    %c0_i32_2 = arith.constant 0 : i32
    return %c0_i32, %c0_i32_0, %c0_i32_1 : i32, i32, i32
  }
  func.func @transform_4(%arg0: i32) -> (i32, i32) {
    %c0_i32 = arith.constant 0 : i32
    %c0_i32_0 = arith.constant 0 : i32
    %c0_i32_1 = arith.constant 0 : i32
    return %c0_i32, %c0_i32_0 : i32, i32
  }
  func.func @transform_5(%arg0: i32) -> (i32, i32) {
    %c0_i32 = arith.constant 0 : i32
    %c0_i32_0 = arith.constant 0 : i32
    return %c0_i32, %arg0 : i32, i32
  }
  func.func @transform_6(%arg0: i32) -> (i32, i32) {
    %c0_i32 = arith.constant 0 : i32
    %c0_i32_0 = arith.constant 0 : i32
    return %c0_i32, %arg0 : i32, i32
  }
}

</mosaic_0001>

<bundles_post_ra>
// kernel: residual_block_nchw.1
= control target key start
LH: loop header
LB: loop body
LE: loop exit
PB: predicated region body
PF: predicated region fallthrough
CT: control target
= control target key end

     0   :  { %s1503_s25 = smov 1   ;;  %s1504_s30 = smov 127   ;;  %v1506_v4 = vmov 0.0   ;;  %v1511_v5 = vmov 0   ;;  %v35_v7 = vlaneseq  ;;  %vm231_vm2 = vcmask 195584   ;;  %s2084_s0 = inlined_call_operand.vmem [shape: f32[8,512], index: 0, kind: input, shape index: {}]   ;;  %s2085_s2 = inlined_call_operand.vmem [shape: f32[8,1], index: 2, kind: input, shape index: {}]   ;;  %s2086_s5 = inlined_call_operand.vmem [shape: f32[9,512], index: 5, kind: input, shape index: {}]   ;;  %s2087_s1 = inlined_call_operand.vmem [shape: f32[3,8,24], index: 1, kind: input, shape index: {}]   ;;  %s2088_s4 = inlined_call_operand.vmem [shape: f32[8,1], index: 4, kind: input, shape index: {}]   ;;  %s2089_s3 = inlined_call_operand.vmem [shape: f32[3,8,24], index: 3, kind: input, shape index: {}]   ;;  %s2090_s6 = inlined_call_operand.vmem [shape: f32[8,512], index: 6, kind: output, shape index: {}]  }
   0x1   :  { %v1551_v0 = vld [vmem:[%s2084_s0 + $0x10] sm:$0xff]  ;;  %v1556_v1 = vld [vmem:[%s2084_s0] sm:$0xff]  ;;  %v1565_v2 = vld [vmem:[%s2084_s0 + $0x18] sm:$0xff]  ;;  %299 = vmatprep.mubr.f32.mxu0 %v1506_v4  ;;  %370 = vmatprep.mubr.f32.mxu1 %v1506_v4  ;;  %s1507_s7 = smov 16   ;;  %s1508_s8 = smov 15  }
   0x2   :  { %153 = vrot.lane.b32.xlu1 %v1551_v0, %s1503_s25  ;;  %149 = vrot.lane.b32.xlu0 %v1556_v1, %s1503_s25  ;;  %v1570_v3 = vld [vmem:[%s2084_s0 + $0x8] sm:$0xff]  ;;  %s1505_s0 = smov 17   ;;  %s1509_s9 = smov 113   ;;  %v793_v6 = vld [vmem:[%s2085_s2] sm:$0xff]  ;;  %v45_v8 = vshrl.u32 %v35_v7, 7  ;;  %v1637_v9 = vand.u32 127, %v35_v7 }
   0x3   :  { %s1510_s10 = smov 112   ;;  %1502 = vset.pattern.permute.xlu0 %v1511_v5  ;;  %s1512_s11 = smov 111   ;;  %v1407_v14 = vld [vmem:[%s2086_s5 + $0x3] ss:$8 sm:$0xf] }
   0x4   :  { %v1639_v10 = vsub.s32 0, %v45_v8  ;;  %v1641_v11 = vsub.s32 2, %v45_v8  ;;  %v1643_v12 = vsub.s32 1, %v45_v8  ;;  %v1645_v13 = vsub.s32 3, %v45_v8  ;;  %v1409_v52 = vld [vmem:[%s2087_s1 + $0x8] sm:$0xff] }
   0x5   :  { %vm157_vm0 = vcmp.lt.s32.totalorder %v1637_v9, 1  ;;  %v1408_v32 = vld [vmem:[%s2086_s5 + $0x5] ss:$8 sm:$0xf]  ;;  %vm197_vm1 = vcmp.lt.s32.totalorder %v1637_v9, 127  ;;  %vm37_vm3 = vcmp.lt.s32.totalorder %v1637_v9, 17 }
   0x6   :  { %155 = vrot.lane.b32.xlu1 %v1565_v2, %s1503_s25  ;;  %151 = vrot.lane.b32.xlu0 %v1570_v3, %s1503_s25  ;;  %v1652_v17 = vrot.slane %v1407_v14, %v1639_v10  ;;  %v1655_v18 = vrot.slane %v1407_v14, %v1641_v11  ;;  %v1658_v19 = vrot.slane %v1407_v14, %v1643_v12  ;;  %v42_v55 = vld [vmem:[%s2086_s5] ss:$8 sm:$0xf]  ;;  %v1405_v56 = vld [vmem:[%s2086_s5 + $0x1] ss:$8 sm:$0xf] }
   0x7   :  { %v1661_v20 = vrot.slane %v1407_v14, %v1645_v13  ;;  %v1684_v38 = vrot.slane %v1408_v32, %v1645_v13  ;;  %v1687_v39 = vrot.slane %v1408_v32, %v1643_v12  ;;  %v1690_v40 = vrot.slane %v1408_v32, %v1641_v11 }
   0x8   :  { %v1693_v41 = vrot.slane %v1408_v32, %v1639_v10  ;;  %v1722_v59 = vrot.slane %v42_v55, %v1643_v12  ;;  %vm76_vm4 = vcmp.lt.s32.totalorder %v1637_v9, 16  ;;  %v1726_v60 = vrot.slane %v1405_v56, %v1643_v12 }
   0x9   :  { %v1731_v62 = vrot.slane %v42_v55, %v1639_v10  ;;  %v1734_v63 = vrot.slane %v42_v55, %v1641_v11  ;;  %v1737_v5 = vrot.slane %v42_v55, %v1645_v13  ;;  %vm116_vm5 = vcmp.lt.s32.totalorder %v1637_v9, 15 }
   0xa   :  { %191 = vrot.lane.b32.xlu1 %v1570_v3, %s1504_s30  ;;  %189 = vrot.lane.b32.xlu0 %v1556_v1, %s1504_s30  ;;  %vm570_vm6 = vcmp.lt.s32.totalorder %v1637_v9, 112  ;;  %vm530_vm7 = vcmp.lt.s32.totalorder %v1637_v9, 113  ;;  %vm610_vm8 = vcmp.lt.s32.totalorder %v1637_v9, 111 }
   0xe   :  { %195 = vrot.lane.b32.xlu1 %v1565_v2, %s1504_s30  ;;  %193 = vrot.lane.b32.xlu0 %v1551_v0, %s1504_s30 }
  0x12   :  { %29 = vrot.lane.b32.xlu1 %v1570_v3, %s1505_s0  ;;  %27 = vrot.lane.b32.xlu0 %v1556_v1, %s1505_s0 }
  0x16   :  { %33 = vrot.lane.b32.xlu1 %v1565_v2, %s1505_s0  ;;  %31 = vrot.lane.b32.xlu0 %v1551_v0, %s1505_s0 }
  0x1a   :  { %70 = vrot.lane.b32.xlu1 %v1570_v3, %s1507_s7  ;;  %68 = vrot.lane.b32.xlu0 %v1556_v1, %s1507_s7 }
  0x1e   :  { %74 = vrot.lane.b32.xlu1 %v1565_v2, %s1507_s7  ;;  %72 = vrot.lane.b32.xlu0 %v1551_v0, %s1507_s7 }
  0x22   :  { %110 = vrot.lane.b32.xlu1 %v1570_v3, %s1508_s8  ;;  %108 = vrot.lane.b32.xlu0 %v1556_v1, %s1508_s8 }
  0x26   :  { %114 = vrot.lane.b32.xlu1 %v1565_v2, %s1508_s8  ;;  %112 = vrot.lane.b32.xlu0 %v1551_v0, %s1508_s8 }
  0x2a   :  { %524 = vrot.lane.b32.xlu1 %v1570_v3, %s1509_s9  ;;  %522 = vrot.lane.b32.xlu0 %v1556_v1, %s1509_s9 }
  0x2e   :  { %528 = vrot.lane.b32.xlu1 %v1565_v2, %s1509_s9  ;;  %526 = vrot.lane.b32.xlu0 %v1551_v0, %s1509_s9 }
  0x32   :  { %564 = vrot.lane.b32.xlu1 %v1570_v3, %s1510_s10  ;;  %562 = vrot.lane.b32.xlu0 %v1556_v1, %s1510_s10 }
  0x36   :  { %568 = vrot.lane.b32.xlu1 %v1565_v2, %s1510_s10  ;;  %566 = vrot.lane.b32.xlu0 %v1551_v0, %s1510_s10 }
  0x3a   :  { %604 = vrot.lane.b32.xlu1 %v1570_v3, %s1512_s11  ;;  %602 = vrot.lane.b32.xlu0 %v1556_v1, %s1512_s11 }
  0x3e   :  { %608 = vrot.lane.b32.xlu1 %v1565_v2, %s1512_s11  ;;  %606 = vrot.lane.b32.xlu0 %v1551_v0, %s1512_s11 }
  0x42   :  { %796 = vperm.xlu0 %1502, %v793_v6  }
  0x74   :  { %v154_v15 = vpop.permute.xlu1 %153  ;;  %v150_v16 = vpop.permute.xlu0 %149 }
  0x78   :  { %v156_v21 = vpop.permute.xlu1 %155  ;;  %v152_v22 = vpop.permute.xlu0 %151 }
  0x79   :  { %v158_v23 = vsel %vm157_vm0, %v154_v15, %v156_v21  ;;  %v161_v24 = vsel %vm157_vm0, %v156_v21, %v150_v16  ;;  %v159_v25 = vsel %vm157_vm0, %v152_v22, %v154_v15  ;;  %v160_v26 = vsel %vm157_vm0, %v150_v16, %v152_v22  ;;  %v1406_v21 = vld [vmem:[%s2086_s5 + $0x2] ss:$8 sm:$0xf] }
  0x7a   :  { %v185_v27 = vmul.f32 %v1652_v17, %v161_v24  ;;  %v187_v28 = vmul.f32 %v1655_v18, %v159_v25  ;;  %v186_v29 = vmul.f32 %v1658_v19, %v160_v26  ;;  %v188_v30 = vmul.f32 %v1661_v20, %v158_v23 }
  0x7b   :  { %v1744_v15 = vrot.slane %v1405_v56, %v1639_v10  ;;  %v1747_v16 = vrot.slane %v1405_v56, %v1641_v11  ;;  %v1757_v25 = vrot.slane %v1405_v56, %v1645_v13 }
  0x7c   :  { %v192_v31 = vpop.permute.xlu1 %191  ;;  %v190_v33 = vpop.permute.xlu0 %189  ;;  %v1428_v34 = vpack.c.bf16 %v1570_v3, %v186_v29  ;;  %v1432_v35 = vpack.c.bf16 %v1565_v2, %v188_v30  ;;  %v1430_v36 = vpack.c.bf16 %v1556_v1, %v185_v27  ;;  %v1434_v37 = vpack.c.bf16 %v1551_v0, %v187_v28 }
  0x7d   :  { %v200_v42 = vsel %vm197_vm1, %v190_v33, %v192_v31 }
  0x7e   :  { %1429 = vmatprep.subr.bf16.mxu0 %v1428_v34  ;;  %1433 = vmatprep.subr.bf16.mxu1 %v1432_v35  ;;  %v225_v51 = vmul.f32 %v1693_v41, %v200_v42 }
  0x7f   :  { %1431 = vmatpush1.bf16.msra.mxu0 %v1430_v36  ;;  %1435 = vmatpush1.bf16.msra.mxu1 %v1434_v37 }
  0x80   :  { %v196_v43 = vpop.permute.xlu1 %195  ;;  %v194_v44 = vpop.permute.xlu0 %193 }
  0x81   :  { %v201_v45 = vsel %vm197_vm1, %v196_v43, %v190_v33  ;;  %v198_v46 = vsel %vm197_vm1, %v194_v44, %v196_v43  ;;  %v199_v47 = vsel %vm197_vm1, %v192_v31, %v194_v44  ;;  %v1764_v31 = vrot.slane %v1406_v21, %v1643_v12 }
  0x82   :  { %v228_v48 = vmul.f32 %v1684_v38, %v201_v45  ;;  %v226_v49 = vmul.f32 %v1687_v39, %v199_v47  ;;  %v227_v50 = vmul.f32 %v1690_v40, %v198_v46 }
  0x84   :  { %v30_v53 = vpop.permute.xlu1 %29  ;;  %239 = vmatprep.subr.mxu0 %v226_v49  ;;  %310 = vmatprep.subr.mxu1 %v228_v48  ;;  %v28_v54 = vpop.permute.xlu0 %27 }
  0x85   :  { %240 = vmatpush1.msra.mxu0 %v225_v51  ;;  %311 = vmatpush1.msra.mxu1 %v227_v50  ;;  %v40_v61 = vsel %vm37_vm3, %v28_v54, %v30_v53  ;;  %v1780_v50 = vrot.slane %v1406_v21, %v1639_v10 }
  0x86   :  { %1410 = vmatmul.mubr.msk.f32.vlgmr.msra.gmra.mrb[0].mxu0 %vm231_vm2, %v1409_v52  ;;  %1411 = vmatmul.mubr.msk.f32.vlgmr.msra.gmra.mrb[0].mxu1 %vm231_vm2, %v1409_v52  ;;  %v65_v22 = vmul.f32 %v1722_v59, %v40_v61  ;;  %v1784_v52 = vrot.slane %v1406_v21, %v1641_v11 }
  0x87   :  { %444 = vmatprep.mubr.f32.mxu0 %v1506_v4  ;;  %515 = vmatprep.mubr.f32.mxu1 %v1506_v4 }
  0x88   :  { %v34_v57 = vpop.permute.xlu1 %33  ;;  %v32_v58 = vpop.permute.xlu0 %31 }
  0x89   :  { %v41_v8 = vsel %vm37_vm3, %v34_v57, %v28_v54  ;;  %v39_v23 = vsel %vm37_vm3, %v30_v53, %v32_v58  ;;  %v38_v26 = vsel %vm37_vm3, %v32_v58, %v34_v57  ;;  %v1787_v53 = vrot.slane %v1406_v21, %v1645_v13 }
  0x8a   :  { %v64_v27 = vmul.f32 %v1731_v62, %v41_v8  ;;  %v66_v32 = vmul.f32 %v1734_v63, %v39_v23  ;;  %v67_v36 = vmul.f32 %v1737_v5, %v38_v26  ;;  %v148_v8 = vld [vmem:[%s2087_s1] sm:$0xff] }
  0x8b   :  { %v1414_v26 = vld [vmem:[%s2086_s5 + $0x6] ss:$8 sm:$0xf] }
  0x8c   :  { %v71_v6 = vpop.permute.xlu1 %70  ;;  %v69_v7 = vpop.permute.xlu0 %68 }
  0x8d   :  { %v79_v14 = vsel %vm76_vm4, %v69_v7, %v71_v6 }
  0x8e   :  { %v105_v24 = vmul.f32 %v1726_v60, %v79_v14 }
  0x90   :  { %v75_v28 = vpop.permute.xlu1 %74  ;;  %v73_v29 = vpop.permute.xlu0 %72  ;;  %v1436_v30 = vpack.c.bf16 %v105_v24, %v65_v22  ;;  %v1415_v24 = vld [vmem:[%s2086_s5 + $0x7] ss:$8 sm:$0xf] }
  0x91   :  { %v80_v33 = vsel %vm76_vm4, %v75_v28, %v69_v7  ;;  %v77_v34 = vsel %vm76_vm4, %v73_v29, %v75_v28  ;;  %v78_v35 = vsel %vm76_vm4, %v71_v6, %v73_v29  ;;  %v1817_v28 = vrot.slane %v1414_v26, %v1643_v12 }
  0x92   :  { %v104_v37 = vmul.f32 %v1744_v15, %v80_v33  ;;  %v106_v42 = vmul.f32 %v1747_v16, %v78_v35  ;;  %v107_v43 = vmul.f32 %v1757_v25, %v77_v34  ;;  %1437 = vmatprep.subr.bf16.mxu0 %v1436_v30  ;;  %v1822_v33 = vrot.slane %v1414_v26, %v1641_v11 }
  0x93   :  { %v1827_v35 = vrot.slane %v1415_v24, %v1639_v10 }
  0x94   :  { %v1438_v44 = vpack.c.bf16 %v104_v37, %v64_v27  ;;  %v1442_v45 = vpack.c.bf16 %v106_v42, %v66_v32  ;;  %v111_v46 = vpop.permute.xlu1 %110  ;;  %v109_v47 = vpop.permute.xlu0 %108  ;;  %v1440_v48 = vpack.c.bf16 %v107_v43, %v67_v36  ;;  %v1814_v27 = vrot.slane %v1414_v26, %v1645_v13 }
  0x95   :  { %v119_v49 = vsel %vm116_vm5, %v109_v47, %v111_v46  ;;  %v1832_v37 = vrot.slane %v1415_v24, %v1645_v13  ;;  %v1835_v42 = vrot.slane %v1415_v24, %v1643_v12  ;;  %v1838_v43 = vrot.slane %v1415_v24, %v1641_v11 }
  0x96   :  { %v145_v51 = vmul.f32 %v1764_v31, %v119_v49  ;;  %1439 = vmatpush1.bf16.msra.mxu0 %v1438_v44  ;;  %1441 = vmatprep.subr.bf16.mxu1 %v1440_v48  ;;  %v1841_v44 = vrot.slane %v1414_v26, %v1639_v10 }
  0x97   :  { %1443 = vmatpush1.bf16.msra.mxu1 %v1442_v45 }
  0x98   :  { %v115_v54 = vpop.permute.xlu1 %114  ;;  %384 = vmatprep.subr.mxu0 %v145_v51  ;;  %v113_v55 = vpop.permute.xlu0 %112 }
  0x99   :  { %v120_v56 = vsel %vm116_vm5, %v115_v54, %v109_v47  ;;  %v117_v57 = vsel %vm116_vm5, %v113_v55, %v115_v54  ;;  %v118_v58 = vsel %vm116_vm5, %v111_v46, %v113_v55 }
  0x9a   :  { %v144_v61 = vmul.f32 %v1780_v50, %v120_v56  ;;  %v146_v6 = vmul.f32 %v1784_v52, %v118_v58  ;;  %v147_v7 = vmul.f32 %v1787_v53, %v117_v57 }
  0x9c   :  { %v525_v14 = vpop.permute.xlu1 %524  ;;  %385 = vmatpush1.msra.mxu0 %v144_v61  ;;  %455 = vmatprep.subr.mxu1 %v147_v7  ;;  %v523_v21 = vpop.permute.xlu0 %522 }
  0x9d   :  { %456 = vmatpush1.msra.mxu1 %v146_v6  ;;  %1412 = vmatmul.mubr.msk.f32.vlgmr.msra.gmra.mrb[0].mxu0 %vm231_vm2, %v148_v8  ;;  %v533_v46 = vsel %vm530_vm7, %v523_v21, %v525_v14 }
  0x9e   :  { %1413 = vmatmul.mubr.msk.f32.vlgmr.msra.gmra.mrb[0].mxu1 %vm231_vm2, %v148_v8  ;;  %711 = vmatprep.mubr.f32.mxu0 %v1506_v4  ;;  %v558_v8 = vmul.f32 %v1841_v44, %v533_v46 }
  0x9f   :  { %782 = vmatprep.mubr.f32.mxu1 %v1506_v4 }
  0xa0   :  { %v529_v22 = vpop.permute.xlu1 %528  ;;  %v527_v23 = vpop.permute.xlu0 %526 }
  0xa1   :  { %v534_v32 = vsel %vm530_vm7, %v529_v22, %v523_v21  ;;  %v532_v34 = vsel %vm530_vm7, %v525_v14, %v527_v23  ;;  %v531_v45 = vsel %vm530_vm7, %v527_v23, %v529_v22  ;;  %v1416_v22 = vld [vmem:[%s2086_s5 + $0x20] ss:$8 sm:$0xf] }
  0xa2   :  { %v561_v47 = vmul.f32 %v1814_v27, %v534_v32  ;;  %v559_v48 = vmul.f32 %v1817_v28, %v532_v34  ;;  %v560_v58 = vmul.f32 %v1822_v33, %v531_v45  ;;  %v1869_v32 = vrot.slane %v1416_v22, %v1643_v12 }
  0xa3   :  { %v1872_v34 = vrot.slane %v1416_v22, %v1641_v11 }
  0xa4   :  { %v565_v29 = vpop.permute.xlu1 %564  ;;  %v563_v30 = vpop.permute.xlu0 %562 }
  0xa5   :  { %v573_v36 = vsel %vm570_vm6, %v563_v30, %v565_v29 }
  0xa6   :  { %v598_v54 = vmul.f32 %v1827_v35, %v573_v36  ;;  %v1875_v36 = vrot.slane %v1416_v22, %v1639_v10 }
  0xa8   :  { %v569_v49 = vpop.permute.xlu1 %568  ;;  %v567_v51 = vpop.permute.xlu0 %566 }
  0xa9   :  { %v574_v55 = vsel %vm570_vm6, %v569_v49, %v563_v30  ;;  %v571_v56 = vsel %vm570_vm6, %v567_v51, %v569_v49  ;;  %v572_v57 = vsel %vm570_vm6, %v565_v29, %v567_v51  ;;  %v1446_v29 = vpack.c.bf16 %v598_v54, %v558_v8  ;;  %v1417_v54 = vld [vmem:[%s2087_s1 + $0x10] sm:$0xff] }
  0xaa   :  { %v601_v61 = vmul.f32 %v1832_v37, %v574_v55  ;;  %v599_v6 = vmul.f32 %v1835_v42, %v572_v57  ;;  %v600_v7 = vmul.f32 %v1838_v43, %v571_v56  ;;  %v1866_v30 = vrot.slane %v1416_v22, %v1645_v13 }
  0xac   :  { %v1450_v14 = vpack.c.bf16 %v600_v7, %v560_v58  ;;  %v605_v21 = vpop.permute.xlu1 %604  ;;  %v603_v23 = vpop.permute.xlu0 %602  ;;  %v1444_v24 = vpack.c.bf16 %v599_v6, %v559_v48  ;;  %v1448_v26 = vpack.c.bf16 %v601_v61, %v561_v47 }
  0xad   :  { %v613_v45 = vsel %vm610_vm8, %v603_v23, %v605_v21 }
  0xae   :  { %1445 = vmatprep.subr.bf16.mxu0 %v1444_v24  ;;  %1449 = vmatprep.subr.bf16.mxu1 %v1448_v26  ;;  %v638_v51 = vmul.f32 %v1875_v36, %v613_v45  ;;  %v1379_v26 = vld [vmem:[%s2088_s4] sm:$0xff] }
  0xaf   :  { %1447 = vmatpush1.bf16.msra.mxu0 %v1446_v29  ;;  %1451 = vmatpush1.bf16.msra.mxu1 %v1450_v14 }
  0xb0   :  { %v609_v46 = vpop.permute.xlu1 %608  ;;  %v607_v47 = vpop.permute.xlu0 %606 }
  0xb1   :  { %v614_v13 = vsel %vm610_vm8, %v609_v46, %v603_v23  ;;  %v611_v12 = vsel %vm610_vm8, %v607_v47, %v609_v46  ;;  %v612_v11 = vsel %vm610_vm8, %v605_v21, %v607_v47 }
  0xb2   :  { %v641_v48 = vmul.f32 %v1866_v30, %v614_v13  ;;  %v639_v10 = vmul.f32 %v1869_v32, %v612_v11  ;;  %v640_v49 = vmul.f32 %v1872_v34, %v611_v12 }
  0xb4   :  { %651 = vmatprep.subr.mxu0 %v639_v10  ;;  %722 = vmatprep.subr.mxu1 %v641_v48 }
  0xb5   :  { %652 = vmatpush1.msra.mxu0 %v638_v51  ;;  %723 = vmatpush1.msra.mxu1 %v640_v49 }
  0xb6   :  { %1418 = vmatmul.mubr.msk.f32.vlgmr.msra.gmra.mrb[0].mxu0 %vm231_vm2, %v1417_v54  ;;  %1419 = vmatmul.mubr.msk.f32.vlgmr.msra.gmra.mrb[0].mxu1 %vm231_vm2, %v1417_v54 }
  0xb7   :  { %957 = vmatprep.mubr.f32.mxu0 %v1506_v4  ;;  %1028 = vmatprep.mubr.f32.mxu1 %v1506_v4 }
  0xc1   :  { %v797_v55 = vpop.permute.xlu0 %796 }
 0x189   :  { %v713_v56 = vpop.f32.mrb[0].mxu0  ;;  %v784_v57 = vpop.f32.mrb[0].mxu1 }
 0x18a   :  { %v799_v58 = vadd.f32 %v797_v55, %v713_v56  ;;  %v801_v61 = vadd.f32 %v797_v55, %v784_v57  ;;  %v715_v6 = vpop.f32.mrb[1].mxu0  ;;  %v786_v7 = vpop.f32.mrb[1].mxu1 }
 0x18b   :  { %v800_v21 = vadd.f32 %v797_v55, %v715_v6  ;;  %v802_v23 = vadd.f32 %v797_v55, %v786_v7 }
 0x18c   :  { %v1896_v8 = vmax.f32 %v799_v58, 0.0  ;;  %v1898_v14 = vmax.f32 %v801_v61, 0.0 }
 0x18d   :  { %v804_v22 = vmax.f32 %v800_v21, 0.0  ;;  %v806_v24 = vmax.f32 %v802_v23, 0.0 }
 0x18e   :  { %860 = vrot.lane.b32.xlu0 %v1898_v14, %s1503_s25  ;;  %856 = vrot.lane.b32.xlu1 %v1896_v8, %s1503_s25 }
 0x192   :  { %872 = vrot.lane.b32.xlu0 %v1896_v8, %s1504_s30  ;;  %858 = vrot.lane.b32.xlu1 %v804_v22, %s1503_s25 }
 0x196   :  { %876 = vrot.lane.b32.xlu0 %v1898_v14, %s1504_s30  ;;  %862 = vrot.lane.b32.xlu1 %v806_v24, %s1503_s25 }
 0x19a   :  { %807 = vrot.lane.b32.xlu0 %v1896_v8, %s1505_s0  ;;  %874 = vrot.lane.b32.xlu1 %v804_v22, %s1504_s30 }
 0x19e   :  { %811 = vrot.lane.b32.xlu0 %v1898_v14, %s1505_s0  ;;  %878 = vrot.lane.b32.xlu1 %v806_v24, %s1504_s30 }
 0x1a2   :  { %823 = vrot.lane.b32.xlu0 %v1896_v8, %s1507_s7  ;;  %809 = vrot.lane.b32.xlu1 %v804_v22, %s1505_s0 }
 0x1a6   :  { %827 = vrot.lane.b32.xlu0 %v1898_v14, %s1507_s7  ;;  %813 = vrot.lane.b32.xlu1 %v806_v24, %s1505_s0 }
 0x1aa   :  { %839 = vrot.lane.b32.xlu0 %v1896_v8, %s1508_s8  ;;  %825 = vrot.lane.b32.xlu1 %v804_v22, %s1507_s7 }
 0x1ae   :  { %843 = vrot.lane.b32.xlu0 %v1898_v14, %s1508_s8  ;;  %829 = vrot.lane.b32.xlu1 %v806_v24, %s1507_s7 }
 0x1b2   :  { %1180 = vrot.lane.b32.xlu0 %v1896_v8, %s1509_s9  ;;  %841 = vrot.lane.b32.xlu1 %v804_v22, %s1508_s8 }
 0x1b6   :  { %1184 = vrot.lane.b32.xlu0 %v1898_v14, %s1509_s9  ;;  %845 = vrot.lane.b32.xlu1 %v806_v24, %s1508_s8 }
 0x1ba   :  { %1196 = vrot.lane.b32.xlu0 %v1896_v8, %s1510_s10  ;;  %1182 = vrot.lane.b32.xlu1 %v804_v22, %s1509_s9 }
 0x1be   :  { %1200 = vrot.lane.b32.xlu0 %v1898_v14, %s1510_s10  ;;  %1186 = vrot.lane.b32.xlu1 %v806_v24, %s1509_s9 }
 0x1c2   :  { %1212 = vrot.lane.b32.xlu0 %v1896_v8, %s1512_s11  ;;  %1198 = vrot.lane.b32.xlu1 %v804_v22, %s1510_s10 }
 0x1c6   :  { %1216 = vrot.lane.b32.xlu0 %v1898_v14, %s1512_s11  ;;  %1202 = vrot.lane.b32.xlu1 %v806_v24, %s1510_s10 }
 0x1ca   :  { %1382 = vperm.xlu0 %1502, %v1379_v26   ;;  %1214 = vrot.lane.b32.xlu1 %v804_v22, %s1512_s11 }
 0x1ce   :  { %1218 = vrot.lane.b32.xlu1 %v806_v24, %s1512_s11 }
 0x200   :  { %v861_v29 = vpop.permute.xlu0 %860  ;;  %v857_v45 = vpop.permute.xlu1 %856 }
 0x204   :  { %v873_v46 = vpop.permute.xlu0 %872  ;;  %v859_v47 = vpop.permute.xlu1 %858 }
 0x205   :  { %v866_v13 = vsel %vm157_vm0, %v857_v45, %v859_v47  ;;  %v865_v12 = vsel %vm157_vm0, %v859_v47, %v861_v29 }
 0x206   :  { %v869_v11 = vmul.f32 %v866_v13, %v1658_v19  ;;  %v870_v51 = vmul.f32 %v865_v12, %v1655_v18 }
 0x208   :  { %v877_v48 = vpop.permute.xlu0 %876  ;;  %v863_v10 = vpop.permute.xlu1 %862  ;;  %v1452_v49 = vpack.c.bf16 %v804_v22, %v869_v11  ;;  %v1458_v7 = vpack.c.bf16 %v1898_v14, %v870_v51  ;;  %v1420_v14 = vld [vmem:[%s2089_s3 + $0x8] sm:$0xff] }
 0x209   :  { %v864_v54 = vsel %vm157_vm0, %v861_v29, %v863_v10  ;;  %v867_v55 = vsel %vm157_vm0, %v863_v10, %v857_v45 }
 0x20a   :  { %v868_v56 = vmul.f32 %v867_v55, %v1652_v17  ;;  %v871_v57 = vmul.f32 %v864_v54, %v1661_v20  ;;  %1453 = vmatprep.subr.bf16.mxu0 %v1452_v49 }
 0x20c   :  { %v1454_v58 = vpack.c.bf16 %v1896_v8, %v868_v56  ;;  %v808_v61 = vpop.permute.xlu0 %807  ;;  %v875_v19 = vpop.permute.xlu1 %874  ;;  %v1456_v6 = vpack.c.bf16 %v806_v24, %v871_v57 }
 0x20d   :  { %v881_v18 = vsel %vm197_vm1, %v875_v19, %v877_v48  ;;  %v882_v21 = vsel %vm197_vm1, %v873_v46, %v875_v19 }
 0x20e   :  { %v885_v22 = vmul.f32 %v881_v18, %v1687_v39  ;;  %1455 = vmatpush1.bf16.msra.mxu0 %v1454_v58  ;;  %1457 = vmatprep.subr.bf16.mxu1 %v1456_v6  ;;  %v884_v17 = vmul.f32 %v882_v21, %v1693_v41 }
 0x20f   :  { %1459 = vmatpush1.bf16.msra.mxu1 %v1458_v7 }
 0x210   :  { %v812_v20 = vpop.permute.xlu0 %811  ;;  %897 = vmatprep.subr.mxu0 %v885_v22  ;;  %v879_v8 = vpop.permute.xlu1 %878 }
 0x211   :  { %v880_v23 = vsel %vm197_vm1, %v877_v48, %v879_v8  ;;  %v883_v24 = vsel %vm197_vm1, %v879_v8, %v873_v46 }
 0x212   :  { %v886_v39 = vmul.f32 %v880_v23, %v1690_v40  ;;  %v887_v26 = vmul.f32 %v883_v24, %v1684_v38  ;;  %898 = vmatpush1.msra.mxu0 %v884_v17 }
 0x213   :  { %1421 = vmatmul.mubr.msk.f32.vlgmr.msra.gmra.mrb[2].mxu0 %vm231_vm2, %v1420_v14 }
 0x214   :  { %v824_v41 = vpop.permute.xlu0 %823  ;;  %968 = vmatprep.subr.mxu1 %v887_v26  ;;  %v810_v29 = vpop.permute.xlu1 %809  ;;  %1102 = vmatprep.mubr.f32.mxu0 %v1506_v4 }
 0x215   :  { %969 = vmatpush1.msra.mxu1 %v886_v39  ;;  %v817_v40 = vsel %vm37_vm3, %v808_v61, %v810_v29  ;;  %v816_v51 = vsel %vm37_vm3, %v810_v29, %v812_v20 }
 0x216   :  { %1422 = vmatmul.mubr.msk.f32.vlgmr.msra.gmra.mrb[2].mxu1 %vm231_vm2, %v1420_v14  ;;  %v820_v12 = vmul.f32 %v817_v40, %v1722_v59  ;;  %v821_v7 = vmul.f32 %v816_v51, %v1734_v63 }
 0x217   :  { %1173 = vmatprep.mubr.f32.mxu1 %v1506_v4 }
 0x218   :  { %v828_v45 = vpop.permute.xlu0 %827  ;;  %v814_v47 = vpop.permute.xlu1 %813 }
 0x219   :  { %v815_v10 = vsel %vm37_vm3, %v812_v20, %v814_v47  ;;  %v818_v49 = vsel %vm37_vm3, %v814_v47, %v808_v61 }
 0x21a   :  { %v819_v58 = vmul.f32 %v818_v49, %v1731_v62  ;;  %v822_v19 = vmul.f32 %v815_v10, %v1737_v5 }
 0x21c   :  { %v840_v46 = vpop.permute.xlu0 %839  ;;  %v826_v38 = vpop.permute.xlu1 %825 }
 0x21d   :  { %v833_v13 = vsel %vm76_vm4, %v824_v41, %v826_v38  ;;  %v832_v11 = vsel %vm76_vm4, %v826_v38, %v828_v45 }
 0x21e   :  { %v836_v48 = vmul.f32 %v833_v13, %v1726_v60  ;;  %v837_v57 = vmul.f32 %v832_v11, %v1747_v16 }
 0x220   :  { %v844_v54 = vpop.permute.xlu0 %843  ;;  %v830_v55 = vpop.permute.xlu1 %829  ;;  %v1460_v56 = vpack.c.bf16 %v836_v48, %v820_v12  ;;  %v1466_v17 = vpack.c.bf16 %v837_v57, %v821_v7 }
 0x221   :  { %v831_v59 = vsel %vm76_vm4, %v828_v45, %v830_v55  ;;  %v834_v60 = vsel %vm76_vm4, %v830_v55, %v824_v41 }
 0x222   :  { %v835_v61 = vmul.f32 %v834_v60, %v1744_v15  ;;  %v838_v6 = vmul.f32 %v831_v59, %v1757_v25  ;;  %1461 = vmatprep.subr.bf16.mxu0 %v1460_v56 }
 0x224   :  { %v1462_v18 = vpack.c.bf16 %v835_v61, %v819_v58  ;;  %v1181_v21 = vpop.permute.xlu0 %1180  ;;  %v842_v16 = vpop.permute.xlu1 %841  ;;  %v1464_v22 = vpack.c.bf16 %v838_v6, %v822_v19 }
 0x225   :  { %v849_v20 = vsel %vm116_vm5, %v840_v46, %v842_v16  ;;  %v848_v62 = vsel %vm116_vm5, %v842_v16, %v844_v54 }
 0x226   :  { %v852_v8 = vmul.f32 %v849_v20, %v1764_v31  ;;  %1463 = vmatpush1.bf16.msra.mxu0 %v1462_v18  ;;  %1465 = vmatprep.subr.bf16.mxu1 %v1464_v22  ;;  %v855_v31 = vld [vmem:[%s2089_s3] sm:$0xff]  ;;  %v853_v24 = vmul.f32 %v848_v62, %v1784_v52 }
 0x227   :  { %1467 = vmatpush1.bf16.msra.mxu1 %v1466_v17 }
 0x228   :  { %v1185_v5 = vpop.permute.xlu0 %1184  ;;  %1042 = vmatprep.subr.mxu0 %v852_v8  ;;  %v846_v15 = vpop.permute.xlu1 %845 }
 0x229   :  { %v847_v63 = vsel %vm116_vm5, %v844_v54, %v846_v15  ;;  %v850_v25 = vsel %vm116_vm5, %v846_v15, %v840_v46 }
 0x22a   :  { %v851_v14 = vmul.f32 %v850_v25, %v1780_v50  ;;  %v854_v23 = vmul.f32 %v847_v63, %v1787_v53 }
 0x22c   :  { %v1197_v39 = vpop.permute.xlu0 %1196  ;;  %1043 = vmatpush1.msra.mxu0 %v851_v14  ;;  %1113 = vmatprep.subr.mxu1 %v854_v23  ;;  %v1183_v26 = vpop.permute.xlu1 %1182 }
 0x22d   :  { %1114 = vmatpush1.msra.mxu1 %v853_v24  ;;  %1423 = vmatmul.mubr.msk.f32.vlgmr.msra.gmra.mrb[2].mxu0 %vm231_vm2, %v855_v31  ;;  %v1189_v41 = vsel %vm530_vm7, %v1183_v26, %v1185_v5  ;;  %v1190_v52 = vsel %vm530_vm7, %v1181_v21, %v1183_v26 }
 0x22e   :  { %1424 = vmatmul.mubr.msk.f32.vlgmr.msra.gmra.mrb[2].mxu1 %vm231_vm2, %v855_v31  ;;  %1297 = vmatprep.mubr.f32.mxu0 %v1506_v4  ;;  %v1192_v40 = vmul.f32 %v1190_v52, %v1841_v44  ;;  %v1193_v46 = vmul.f32 %v1189_v41, %v1817_v28 }
 0x22f   :  { %1368 = vmatprep.mubr.f32.mxu1 %v1506_v4 }
 0x230   :  { %v1201_v50 = vpop.permute.xlu0 %1200  ;;  %v1187_v53 = vpop.permute.xlu1 %1186 }
 0x231   :  { %v1188_v12 = vsel %vm530_vm7, %v1185_v5, %v1187_v53  ;;  %v1191_v11 = vsel %vm530_vm7, %v1187_v53, %v1181_v21 }
 0x232   :  { %v1194_v44 = vmul.f32 %v1188_v12, %v1822_v33 }
 0x234   :  { %v1199_v29 = vpop.permute.xlu1 %1198  ;;  %v1213_v4 = vpop.permute.xlu0 %1212 }
 0x235   :  { %v1205_v45 = vsel %vm570_vm6, %v1199_v29, %v1201_v50  ;;  %v1206_v47 = vsel %vm570_vm6, %v1197_v39, %v1199_v29 }
 0x236   :  { %v1208_v38 = vmul.f32 %v1206_v47, %v1827_v35  ;;  %v1209_v13 = vmul.f32 %v1205_v45, %v1835_v42  ;;  %v1195_v35 = vmul.f32 %v1191_v11, %v1814_v27 }
 0x238   :  { %v1470_v48 = vpack.c.bf16 %v1208_v38, %v1192_v40  ;;  %v1203_v10 = vpop.permute.xlu1 %1202  ;;  %v1468_v49 = vpack.c.bf16 %v1209_v13, %v1193_v46  ;;  %v1217_v55 = vpop.permute.xlu0 %1216 }
 0x239   :  { %v1204_v51 = vsel %vm570_vm6, %v1201_v50, %v1203_v10  ;;  %v1207_v28 = vsel %vm570_vm6, %v1203_v10, %v1197_v39 }
 0x23a   :  { %v1210_v42 = vmul.f32 %v1204_v51, %v1838_v43  ;;  %v1211_v54 = vmul.f32 %v1207_v28, %v1832_v37  ;;  %1469 = vmatprep.subr.bf16.mxu0 %v1468_v49  ;;  %v1425_v37 = vld [vmem:[%s2089_s3 + $0x10] sm:$0xff] }
 0x23b   :  { %1471 = vmatpush1.bf16.msra.mxu0 %v1470_v48 }
 0x23c   :  { %v1474_v56 = vpack.c.bf16 %v1210_v42, %v1194_v44  ;;  %v1215_v57 = vpop.permute.xlu1 %1214  ;;  %v1472_v59 = vpack.c.bf16 %v1211_v54, %v1195_v35 }
 0x23d   :  { %v1221_v60 = vsel %vm610_vm8, %v1215_v57, %v1217_v55  ;;  %v1222_v58 = vsel %vm610_vm8, %v1213_v4, %v1215_v57 }
 0x23e   :  { %v1224_v33 = vmul.f32 %v1222_v58, %v1875_v36  ;;  %v1225_v27 = vmul.f32 %v1221_v60, %v1869_v32  ;;  %1473 = vmatprep.subr.bf16.mxu1 %v1472_v59 }
 0x23f   :  { %1475 = vmatpush1.bf16.msra.mxu1 %v1474_v56 }
 0x240   :  { %1237 = vmatprep.subr.mxu0 %v1225_v27  ;;  %v1219_v43 = vpop.permute.xlu1 %1218 }
 0x241   :  { %v1220_v19 = vsel %vm610_vm8, %v1217_v55, %v1219_v43  ;;  %v1223_v61 = vsel %vm610_vm8, %v1219_v43, %v1213_v4  ;;  %1238 = vmatpush1.msra.mxu0 %v1224_v33 }
 0x242   :  { %v1226_v6 = vmul.f32 %v1220_v19, %v1872_v34  ;;  %v1227_v36 = vmul.f32 %v1223_v61, %v1866_v30  ;;  %1426 = vmatmul.mubr.msk.f32.vlgmr.msra.gmra.mrb[2].mxu0 %vm231_vm2, %v1425_v37 }
 0x244   :  { %1308 = vmatprep.subr.mxu1 %v1227_v36 }
 0x245   :  { %1309 = vmatpush1.msra.mxu1 %v1226_v6 }
 0x246   :  { %1427 = vmatmul.mubr.msk.f32.vlgmr.msra.gmra.mrb[2].mxu1 %vm231_vm2, %v1425_v37 }
 0x249   :  { %v1383_v32 = vpop.permute.xlu0 %1382 }
 0x315   :  { %v1299_v7 = vpop.f32.mrb[2].mxu0 }
 0x316   :  { %v1385_v18 = vadd.f32 %v1383_v32, %v1299_v7  ;;  %v1301_v21 = vpop.f32.mrb[3].mxu0 }
 0x317   :  { %v1386_v16 = vadd.f32 %v1383_v32, %v1301_v21 }
 0x318   :  { %v1389_v22 = vadd.f32 %v1385_v18, %v1556_v1 }
 0x319   :  { %v1390_v9 = vadd.f32 %v1386_v16, %v1570_v3  ;;  %v1370_v17 = vpop.f32.mrb[2].mxu1 }
 0x31a   :  { %v1393_v20 = vmax.f32 %v1389_v22, 0.0  ;;  %v1387_v34 = vadd.f32 %v1383_v32, %v1370_v17  ;;  %v1372_v8 = vpop.f32.mrb[3].mxu1 }
 0x31b   :  { %v1394_v30 = vmax.f32 %v1390_v9, 0.0  ;;  %v1388_v62 = vadd.f32 %v1383_v32, %v1372_v8 }
 0x31c   :  { %1397 = vst [vmem:[%s2090_s6] sm:$0xff] %v1393_v20  ;;  %v1391_v5 = vadd.f32 %v1387_v34, %v1551_v0 }
 0x31d   :  { %1398 = vst [vmem:[%s2090_s6 + $0x8] sm:$0xff] %v1394_v30  ;;  %v1392_v1 = vadd.f32 %v1388_v62, %v1565_v2 }
 0x31e   :  { %v1395_v15 = vmax.f32 %v1391_v5, 0.0 }
 0x31f   :  { %v1396_v3 = vmax.f32 %v1392_v1, 0.0 }
 0x320   :  { %1399 = vst [vmem:[%s2090_s6 + $0x10] sm:$0xff] %v1395_v15 }
 0x321   :  { %1400 = vst [vmem:[%s2090_s6 + $0x18] sm:$0xff] %v1396_v3 }

</bundles_post_ra>
